<compile_context>
chip_gen: v7x
topology: tpu7x:2x2x1
jax: 0.10.0
libtpu: 0.0.40
codegen_flags: <defaults>
</compile_context>

<pallas_src>
import functools

import jax
import jax.numpy as jnp
import numpy as np
from jax import lax
from jax.experimental import pallas as pl
from jax.experimental.pallas import tpu as pltpu

_C = 8.0  # self.c in the PyTorch module


def _rglru_kernel(x_ref, wx_ref, wa_ref, ca_ref, o_ref, h_ref):
    """One (batch, seq-chunk) grid step.

    x_ref  : (1, T, E) f32   input slab
    wx_ref : (E, E)    bf16  W_in[:E, :].T  (gate_x weight)
    wa_ref : (E, E)    bf16  W_in[E:, :].T  (gate_a weight)
    ca_ref : (1, E)    f32   precomputed -c * softplus(a), tiled over heads
    o_ref  : (1, T, E) f32   output slab
    h_ref  : (1, E)    f32   VMEM scratch: hidden state carried across chunks
    """
    seq_id = pl.program_id(1)

    @pl.when(seq_id == 0)
    def _():
        h_ref[...] = jnp.zeros_like(h_ref)

    T = x_ref.shape[1]
    E = x_ref.shape[2]

    x = x_ref[0].astype(jnp.float32)                        # (T, E)
    xb = x.astype(jnp.bfloat16)

    # Two lane-aligned (E, E) matmuls instead of one (E, 2E) matmul + slicing.
    gate_x = jax.nn.sigmoid(
        jnp.dot(xb, wx_ref[...], preferred_element_type=jnp.float32))  # (T, E)
    gate_a = jax.nn.sigmoid(
        jnp.dot(xb, wa_ref[...], preferred_element_type=jnp.float32))  # (T, E)

    log_a = gate_a * ca_ref[...]                            # (T, E)
    a_t = jnp.exp(log_a)
    # exp(2*log_a) == a_t * a_t : one fewer EUP exp; clamp for sqrt safety.
    mult = jnp.sqrt(jnp.maximum(1.0 - a_t * a_t, 0.0))
    b_t = mult * gate_x * x                                 # (T, E)

    # Hillis-Steele log-depth prefix scan over the chunk.
    # After the loop: h_t = A[t] * h_carry + B[t]  for every row t of the chunk.
    A = a_t
    B = b_t
    row = lax.broadcasted_iota(jnp.int32, (T, E), 0)        # hoisted out of loop
    d = 1
    while d < T:                                            # static unroll: log2(T) passes
        keep = row >= d
        A_s = jnp.where(keep, pltpu.roll(A, shift=d, axis=0), 1.0)
        B_s = jnp.where(keep, pltpu.roll(B, shift=d, axis=0), 0.0)
        B = A * B_s + B
        A = A * A_s
        d *= 2

    h_prev = h_ref[...]                                     # (1, E), broadcast over T
    h_all = A * h_prev + B                                  # (T, E)

    o_ref[0] = h_all.astype(o_ref.dtype)                    # one lane-dense store
    h_ref[...] = h_all[T - 1:T, :]                          # carry last row


def _pick_chunk(S, block_seq):
    """Largest seq-chunk <= block_seq that divides S and keeps (8,128)-legal blocks."""
    T = min(block_seq, S)
    if S % T == 0 and (T == S or T % 8 == 0):
        return T
    best = None
    for cand in range(8, min(block_seq, S) + 1, 8):
        if S % cand == 0:
            best = cand
    return best if best is not None else S   # fallback: whole sequence (full-dim block)


@functools.partial(jax.jit, static_argnames=("nb_heads", "block_seq"))
def rglru_forward(x, w_in, a_param, *, nb_heads, block_seq=256):
    """x: (B, S, E) f32; w_in: (2E, E) as in nn.Linear; a_param: (head_dim,)."""
    B, S, E = x.shape
    T = _pick_chunk(S, block_seq)

    # Glue: split/transpose the Linear weight, cast to bf16 for the MXU, and
    # precompute -c*softplus(a) tiled over heads (channel c -> a[c % head_dim]).
    w_x = jnp.transpose(w_in[:E, :]).astype(jnp.bfloat16)       # (E, E)
    w_a = jnp.transpose(w_in[E:, :]).astype(jnp.bfloat16)       # (E, E)
    ca = -_C * jax.nn.softplus(a_param.astype(jnp.float32))     # (head_dim,)
    ca = jnp.tile(ca, nb_heads)[None, :]                        # (1, E)

    grid_spec = pltpu.PrefetchScalarGridSpec(
        num_scalar_prefetch=0,
        grid=(B, S // T),
        in_specs=[
            pl.BlockSpec((1, T, E), lambda b, s: (b, s, 0)),
            # Constant index_map -> DMA'd once, stays VMEM-resident.
            # TODO(synk): single-buffer the constant weights with
            # pipeline_mode=pl.Buffered(1) once verified on the target jax rev.
            pl.BlockSpec((E, E), lambda b, s: (0, 0)),
            pl.BlockSpec((E, E), lambda b, s: (0, 0)),
            pl.BlockSpec((1, E), lambda b, s: (0, 0)),
        ],
        out_specs=pl.BlockSpec((1, T, E), lambda b, s: (b, s, 0)),
        scratch_shapes=[pltpu.VMEM((1, E), jnp.float32)],
    )

    return pl.pallas_call(
        _rglru_kernel,
        out_shape=jax.ShapeDtypeStruct((B, S, E), jnp.float32),
        grid_spec=grid_spec,
        compiler_params=pltpu.CompilerParams(
            dimension_semantics=("parallel", "arbitrary"),
            vmem_limit_bytes=64 * 1024 * 1024,
        ),
    )(x, w_x, w_a, ca)


def rglru_reference(x, w_in, a_param, nb_heads):
    """Pure-JAX reference mirroring the PyTorch forward (conv_size=None).

    Matmul inputs are cast to bf16 (f32 accumulation) to match the kernel's
    mixed-precision gate matmul; everything else is f32.
    """
    B, S, E = x.shape
    w_t = jnp.transpose(w_in).astype(jnp.bfloat16)              # (E, 2E)
    gates = jnp.dot(x.astype(jnp.bfloat16), w_t,
                    preferred_element_type=jnp.float32)         # (B, S, 2E)
    gate_x = jax.nn.sigmoid(gates[..., :E])
    gate_a = jax.nn.sigmoid(gates[..., E:])
    a_sp = jax.nn.softplus(a_param)                             # (head_dim,)
    a_full = jnp.tile(a_sp, nb_heads)                           # (E,)
    log_a = -_C * gate_a * a_full[None, None, :]                # (B, S, E)
    a_t = jnp.exp(log_a)
    mult = jnp.sqrt(1.0 - jnp.exp(2.0 * log_a))
    b_t = mult * gate_x * x                                     # (B, S, E)

    def step(h, ab):
        a_s, b_s = ab
        h = a_s * h + b_s
        return h, h

    _, out = lax.scan(step, jnp.zeros((B, E), jnp.float32),
                      (jnp.swapaxes(a_t, 0, 1), jnp.swapaxes(b_t, 0, 1)))
    return jnp.swapaxes(out, 0, 1)                              # (B, S, E)


if __name__ == "__main__":
    # Small shapes consistent with the module: emb = heads * head_dim.
    bsz, seqlen = 2, 16
    emb_dim, nb_heads = 32, 4
    head_dim = emb_dim // nb_heads

    key = jax.random.PRNGKey(0)
    kx, kw, ka = jax.random.split(key, 3)

    x = jax.random.normal(kx, (bsz, seqlen, emb_dim), dtype=jnp.float32)

    # Deterministic parameter init mimicking reset_parameters():
    in_std = emb_dim ** -0.5
    w_in = in_std * jax.random.truncated_normal(
        kw, -3.0, 3.0, (2 * emb_dim, emb_dim), dtype=jnp.float32)
    a_u = jax.random.uniform(ka, (head_dim,), dtype=jnp.float32,
                             minval=0.9 ** 2 + 1e-8, maxval=0.999 ** 2 + 1e-8)
    a_param = 0.5 * jnp.log(a_u)

    # block_seq=8 so the test exercises the hidden-state carry across 2 chunks.
    out = rglru_forward(x, w_in, a_param, nb_heads=nb_heads, block_seq=8)
    jax.block_until_ready(out)

    ref = rglru_reference(x, w_in, a_param, nb_heads)
    np.testing.assert_allclose(np.asarray(out), np.asarray(ref),
                               rtol=1e-4, atol=1e-4)

    print("KERNEL_OK")
</pallas_src>

<mosaic_0001>
module attributes {stable_mosaic.version = 11 : i64} {
  func.func @_rglru_kernel(%arg0: i32, %arg1: i32, %arg2: memref<1x8x32xf32, #tpu.memory_space<vmem>>, %arg3: memref<32x32xbf16, #tpu.memory_space<vmem>>, %arg4: memref<32x32xbf16, #tpu.memory_space<vmem>>, %arg5: memref<1x32xf32, #tpu.memory_space<vmem>>, %arg6: memref<1x8x32xf32, #tpu.memory_space<vmem>>, %arg7: memref<1x32xf32, #tpu.memory_space<vmem>>) attributes {dimension_semantics = [#tpu.dimension_semantics<parallel>, #tpu.dimension_semantics<arbitrary>], iteration_bounds = array<i64: 2, 2>, scalar_prefetch = 0 : i64, scratch_operands = 1 : i64, tpu.core_type = #tpu.core_type<tc>, window_params = [{transform_indices = @transform_0, window_bounds = array<i64: 1, 8, 32>}, {pipeline_mode = #tpu.pipeline_mode<synchronous>, transform_indices = @transform_1, window_bounds = array<i64: 32, 32>}, {pipeline_mode = #tpu.pipeline_mode<synchronous>, transform_indices = @transform_2, window_bounds = array<i64: 32, 32>}, {pipeline_mode = #tpu.pipeline_mode<synchronous>, transform_indices = @transform_3, window_bounds = array<i64: 1, 32>}, {transform_indices = @transform_4, window_bounds = array<i64: 1, 8, 32>}]} {
    %c0_i32 = arith.constant 0 : i32
    %0 = arith.cmpi eq, %arg1, %c0_i32 : i32
    %1 = arith.extui %0 : i1 to i32
    %c0_i32_0 = arith.constant 0 : i32
    %2 = arith.cmpi ne, %1, %c0_i32_0 : i32
    scf.if %2 {
      %cst_33 = arith.constant 0.000000e+00 : f32
      %75 = vector.broadcast %cst_33 : f32 to vector<1x32xf32>
      %c0_34 = arith.constant 0 : index
      %c0_35 = arith.constant 0 : index
      %76 = vector.load %arg7[%c0_34, %c0_35] : memref<1x32xf32, #tpu.memory_space<vmem>>, vector<1x32xf32>
      tpu.vector_store %arg7[%c0_34, %c0_35], %75 {strides = array<i32>} : memref<1x32xf32, #tpu.memory_space<vmem>>, vector<1x32xf32>,
    } else {
    }
    %c0 = arith.constant 0 : index
    %c0_1 = arith.constant 0 : index
    %c0_2 = arith.constant 0 : index
    %3 = vector.load %arg2[%c0, %c0_1, %c0_2] : memref<1x8x32xf32, #tpu.memory_space<vmem>>, vector<1x8x32xf32>
    %4 = vector.shape_cast %3 : vector<1x8x32xf32> to vector<8x32xf32>
    %5 = arith.truncf %4 : vector<8x32xf32> to vector<8x32xbf16>
    %c0_3 = arith.constant 0 : index
    %c0_4 = arith.constant 0 : index
    %6 = vector.load %arg3[%c0_3, %c0_4] : memref<32x32xbf16, #tpu.memory_space<vmem>>, vector<32x32xbf16>
    %cst = arith.constant dense<0.000000e+00> : vector<8x32xf32>
    %7 = tpu.matmul %5, %6, %cst {dimension_numbers = #tpu.dot_dimension_numbers<[1], [0], [0], [1], [0, 0, 1, 1], [], []>} : vector<8x32xbf16>, vector<32x32xbf16>, vector<8x32xf32> -> vector<8x32xf32>
    %8 = arith.negf %7 : vector<8x32xf32>
    %9 = math.exp %8 : vector<8x32xf32>
    %cst_5 = arith.constant 1.000000e+00 : f32
    %10 = vector.broadcast %cst_5 : f32 to vector<8x32xf32>
    %11 = arith.addf %10, %9 : vector<8x32xf32>
    %12 = arith.divf %10, %11 : vector<8x32xf32>
    %c0_6 = arith.constant 0 : index
    %c0_7 = arith.constant 0 : index
    %13 = vector.load %arg4[%c0_6, %c0_7] : memref<32x32xbf16, #tpu.memory_space<vmem>>, vector<32x32xbf16>
    %cst_8 = arith.constant dense<0.000000e+00> : vector<8x32xf32>
    %14 = tpu.matmul %5, %13, %cst_8 {dimension_numbers = #tpu.dot_dimension_numbers<[1], [0], [0], [1], [0, 0, 1, 1], [], []>} : vector<8x32xbf16>, vector<32x32xbf16>, vector<8x32xf32> -> vector<8x32xf32>
    %15 = arith.negf %14 : vector<8x32xf32>
    %16 = math.exp %15 : vector<8x32xf32>
    %cst_9 = arith.constant 1.000000e+00 : f32
    %17 = vector.broadcast %cst_9 : f32 to vector<8x32xf32>
    %18 = arith.addf %17, %16 : vector<8x32xf32>
    %19 = arith.divf %17, %18 : vector<8x32xf32>
    %c0_10 = arith.constant 0 : index
    %c0_11 = arith.constant 0 : index
    %20 = vector.load %arg5[%c0_10, %c0_11] : memref<1x32xf32, #tpu.memory_space<vmem>>, vector<1x32xf32>
    %21 = vector.broadcast %20 : vector<1x32xf32> to vector<8x32xf32>
    %22 = arith.mulf %19, %21 : vector<8x32xf32>
    %23 = math.exp %22 : vector<8x32xf32>
    %24 = arith.mulf %23, %23 : vector<8x32xf32>
    %cst_12 = arith.constant 1.000000e+00 : f32
    %25 = vector.broadcast %cst_12 : f32 to vector<8x32xf32>
    %26 = arith.subf %25, %24 : vector<8x32xf32>
    %cst_13 = arith.constant 0.000000e+00 : f32
    %27 = vector.broadcast %cst_13 : f32 to vector<8x32xf32>
    %28 = arith.maximumf %26, %27 : vector<8x32xf32>
    %29 = math.sqrt %28 : vector<8x32xf32>
    %30 = arith.mulf %29, %12 : vector<8x32xf32>
    %31 = arith.mulf %30, %4 : vector<8x32xf32>
    %32 = tpu.iota {dimensions = array<i32: 0>} : vector<8x32xi32>
    %c1_i32 = arith.constant 1 : i32
    %33 = vector.broadcast %c1_i32 : i32 to vector<8x32xi32>
    %34 = arith.cmpi sge, %32, %33 : vector<8x32xi32>
    %c1_i32_14 = arith.constant 1 : i32
    %35 = tpu.dynamic_rotate %23 by %c1_i32_14 dim 0 : vector<8x32xf32>, i32 -> vector<8x32xf32>
    %cst_15 = arith.constant 1.000000e+00 : f32
    %36 = vector.broadcast %cst_15 : f32 to vector<8x32xf32>
    %37 = arith.select %34, %35, %36 : vector<8x32xi1>, vector<8x32xf32>
    %c1_i32_16 = arith.constant 1 : i32
    %38 = tpu.dynamic_rotate %31 by %c1_i32_16 dim 0 : vector<8x32xf32>, i32 -> vector<8x32xf32>
    %cst_17 = arith.constant 0.000000e+00 : f32
    %39 = vector.broadcast %cst_17 : f32 to vector<8x32xf32>
    %40 = arith.select %34, %38, %39 : vector<8x32xi1>, vector<8x32xf32>
    %41 = arith.mulf %23, %40 : vector<8x32xf32>
    %42 = arith.addf %41, %31 : vector<8x32xf32>
    %43 = arith.mulf %23, %37 : vector<8x32xf32>
    %c2_i32 = arith.constant 2 : i32
    %44 = vector.broadcast %c2_i32 : i32 to vector<8x32xi32>
    %45 = arith.cmpi sge, %32, %44 : vector<8x32xi32>
    %c2_i32_18 = arith.constant 2 : i32
    %46 = tpu.dynamic_rotate %43 by %c2_i32_18 dim 0 : vector<8x32xf32>, i32 -> vector<8x32xf32>
    %cst_19 = arith.constant 1.000000e+00 : f32
    %47 = vector.broadcast %cst_19 : f32 to vector<8x32xf32>
    %48 = arith.select %45, %46, %47 : vector<8x32xi1>, vector<8x32xf32>
    %c2_i32_20 = arith.constant 2 : i32
    %49 = tpu.dynamic_rotate %42 by %c2_i32_20 dim 0 : vector<8x32xf32>, i32 -> vector<8x32xf32>
    %cst_21 = arith.constant 0.000000e+00 : f32
    %50 = vector.broadcast %cst_21 : f32 to vector<8x32xf32>
    %51 = arith.select %45, %49, %50 : vector<8x32xi1>, vector<8x32xf32>
    %52 = arith.mulf %43, %51 : vector<8x32xf32>
    %53 = arith.addf %52, %42 : vector<8x32xf32>
    %54 = arith.mulf %43, %48 : vector<8x32xf32>
    %c4_i32 = arith.constant 4 : i32
    %55 = vector.broadcast %c4_i32 : i32 to vector<8x32xi32>
    %56 = arith.cmpi sge, %32, %55 : vector<8x32xi32>
    %c4_i32_22 = arith.constant 4 : i32
    %57 = tpu.dynamic_rotate %54 by %c4_i32_22 dim 0 : vector<8x32xf32>, i32 -> vector<8x32xf32>
    %cst_23 = arith.constant 1.000000e+00 : f32
    %58 = vector.broadcast %cst_23 : f32 to vector<8x32xf32>
    %59 = arith.select %56, %57, %58 : vector<8x32xi1>, vector<8x32xf32>
    %c4_i32_24 = arith.constant 4 : i32
    %60 = tpu.dynamic_rotate %53 by %c4_i32_24 dim 0 : vector<8x32xf32>, i32 -> vector<8x32xf32>
    %cst_25 = arith.constant 0.000000e+00 : f32
    %61 = vector.broadcast %cst_25 : f32 to vector<8x32xf32>
    %62 = arith.select %56, %60, %61 : vector<8x32xi1>, vector<8x32xf32>
    %63 = arith.mulf %54, %62 : vector<8x32xf32>
    %64 = arith.addf %63, %53 : vector<8x32xf32>
    %65 = arith.mulf %54, %59 : vector<8x32xf32>
    %c0_26 = arith.constant 0 : index
    %c0_27 = arith.constant 0 : index
    %66 = vector.load %arg7[%c0_26, %c0_27] : memref<1x32xf32, #tpu.memory_space<vmem>>, vector<1x32xf32>
    %67 = vector.broadcast %66 : vector<1x32xf32> to vector<8x32xf32>
    %68 = arith.mulf %65, %67 : vector<8x32xf32>
    %69 = arith.addf %68, %64 : vector<8x32xf32>
    %c0_28 = arith.constant 0 : index
    %c0_29 = arith.constant 0 : index
    %c0_30 = arith.constant 0 : index
    %70 = vector.load %arg6[%c0_28, %c0_29, %c0_30] : memref<1x8x32xf32, #tpu.memory_space<vmem>>, vector<1x8x32xf32>
    %71 = vector.shape_cast %70 : vector<1x8x32xf32> to vector<8x32xf32>
    %72 = vector.shape_cast %69 : vector<8x32xf32> to vector<1x8x32xf32>
    tpu.vector_store %arg6[%c0_28, %c0_29, %c0_30], %72 {strides = array<i32>} : memref<1x8x32xf32, #tpu.memory_space<vmem>>, vector<1x8x32xf32>,
    %73 = vector.extract_strided_slice %69 {offsets = [7, 0], sizes = [1, 32], strides = [1, 1]} : vector<8x32xf32> to vector<1x32xf32>
    %c0_31 = arith.constant 0 : index
    %c0_32 = arith.constant 0 : index
    %74 = vector.load %arg7[%c0_31, %c0_32] : memref<1x32xf32, #tpu.memory_space<vmem>>, vector<1x32xf32>
    tpu.vector_store %arg7[%c0_31, %c0_32], %73 {strides = array<i32>} : memref<1x32xf32, #tpu.memory_space<vmem>>, vector<1x32xf32>,
    return
  }
  func.func @transform_0(%arg0: i32, %arg1: i32) -> (i32, i32, i32) {
    %c0_i32 = arith.constant 0 : i32
    %c0_i32_0 = arith.constant 0 : i32
    return %arg0, %arg1, %c0_i32 : i32, i32, i32
  }
  func.func @transform_1(%arg0: i32, %arg1: i32) -> (i32, i32) {
    %c0_i32 = arith.constant 0 : i32
    %c0_i32_0 = arith.constant 0 : i32
    %c0_i32_1 = arith.constant 0 : i32
    return %c0_i32, %c0_i32_0 : i32, i32
  }
  func.func @transform_2(%arg0: i32, %arg1: i32) -> (i32, i32) {
    %c0_i32 = arith.constant 0 : i32
    %c0_i32_0 = arith.constant 0 : i32
    %c0_i32_1 = arith.constant 0 : i32
    return %c0_i32, %c0_i32_0 : i32, i32
  }
  func.func @transform_3(%arg0: i32, %arg1: i32) -> (i32, i32) {
    %c0_i32 = arith.constant 0 : i32
    %c0_i32_0 = arith.constant 0 : i32
    %c0_i32_1 = arith.constant 0 : i32
    return %c0_i32, %c0_i32_0 : i32, i32
  }
  func.func @transform_4(%arg0: i32, %arg1: i32) -> (i32, i32, i32) {
    %c0_i32 = arith.constant 0 : i32
    %c0_i32_0 = arith.constant 0 : i32
    return %arg0, %arg1, %c0_i32 : i32, i32, i32
  }
}

</mosaic_0001>

<bundles_post_ra>
// kernel: tile.8
= control target key start
LH: loop header
LB: loop body
LE: loop exit
PB: predicated region body
PF: predicated region fallthrough
CT: control target
= control target key end

     0   :  { %s22_s0 = inlined_call_operand.vmem [shape: f32[8], index: 0, kind: input, shape index: {}]   ;;  %s23_s1 = inlined_call_operand.vmem [shape: f32[4,8], index: 1, kind: output, shape index: {}]  }
   0x1   :  { %v4_v0 = vld [vmem:[%s22_s0] ss:$0 sm:$0xff] }
   0x2   :  { %5 = vst [vmem:[%s23_s1] sm:$0xf] %v4_v0 }

// kernel: tile.9
= control target key start
LH: loop header
LB: loop body
LE: loop exit
PB: predicated region body
PF: predicated region fallthrough
CT: control target
= control target key end

     0   :  { %s101_s0 = inlined_call_operand.vmem [shape: f32[4,8], index: 0, kind: input, shape index: {}]   ;;  %s102_s1 = inlined_call_operand.hbm [shape: f32[1,32], index: 1, kind: output, shape index: {}]  }
   0x1   :  { %v5_v0 = vld [vmem:[%s101_s0] sm:$0xf] }
   0x2   :  { %6 = vst [vmem:[#allocation3] sm:$0xf] %v5_v0 }
   0x3   :  { %2 = vsyncpa [#allocation1], 0  ;;  %vm8_vm0 = vcmask 64512   ;;  %s72_s0 = smov 24   ;;  %s73_s8 = smov 8   ;;  %vm14_vm1 = vcmask 261312  }
   0x4   :  { %s74_s9 = smov 16   ;;  %vm20_vm2 = vcmask 195712   ;;  %vm26_vm3 = vcmask 130112   ;;  %s75_s10 = smov [#allocation0]  }
   0x5   :  { %s38_s11 = sshll.u32 %s75_s10, 4  ;;  %s39_s11 = int_to_ptr.vmem [resolvable:$true] %s38_s11 }
   0x6   :  { %s48_s12 = scalar_lea.vmem %s39_s11, 16  ;;  %s52_s13 = scalar_lea.vmem %s39_s11, 32 }
   0x7   :  { %p49_p0 = scmp.ne.s32.totalorder %s39_s11, %s48_s12  ;;  %p53_p1 = scmp.lt.s32.totalorder %s39_s11, %s39_s11 }
   0x8   :  { %p54_p2 = scmp.lt.s32.totalorder %s52_s13, %s48_s12 }
   0x9   :  { %v11_v1 = vld [vmem:[#allocation3 + $0x3] sm:$0x1]   ;;  %v23_v2 = vld [vmem:[#allocation3 + $0x1] sm:$0x1]   ;;  %v7_v3 = vld [vmem:[#allocation3] sm:$0x1]  }
   0xa   :  { %12 = vrot.lane.b32.xlu0 %v11_v1, %s72_s0  ;;  %24 = vrot.lane.b32.xlu1 %v23_v2, %s73_s8  ;;  %v17_v4 = vld [vmem:[#allocation3 + $0x2] sm:$0x1]   ;;  %9 = vst.msk [vmem:[#allocation2] sm:$0x1] %vm8_vm0, %v7_v3   ;;  %p55_p3 = por %p54_p2, %p53_p1 }
   0xc   :  { %p56_p4 = pnand %p55_p3, %p49_p0 }
   0xe   :  { %18 = vrot.lane.b32.xlu0 %v17_v4, %s74_s9 }
  0x7c   :  { %v13_v5 = vpop.permute.xlu0 %12   ;;  %v25_v6 = vpop.permute.xlu1 %24  }
  0x7d   :  { %15 = vst.msk [vmem:[#allocation2] sm:$0x1] %vm14_vm1, %v13_v5  }
  0x80   :  { %v19_v7 = vpop.permute.xlu0 %18  }
  0x81   :  { %21 = vst.msk [vmem:[#allocation2] sm:$0x1] %vm20_vm2, %v19_v7  }
  0x82   :  { %27 = vst.msk [vmem:[#allocation2] sm:$0x1] %vm26_vm3, %v25_v6  }
  0x89   :  { %v31_v8 = vld [vmem:[#allocation2] sm:$0x1] }
  0x8a   :  { %33 = vst [vmem:[#allocation0] sm:$0x1] %v31_v8 }
  0x8b   :  { %59 = shalt.err (!%p56_p4)
}
  0x8c   :  { %s60_s16 = scalar_lea.hbm %s102_s1, 16 }
  0x8d   :  { %p61_p5 = scmp.ne.s32.totalorder %s102_s1, %s60_s16  ;;  %p64_p6 = scmp.lt.u32.totalorder %s60_s16, %s102_s1 }
  0x8f   :  { %p66_p7 = pnand %p64_p6, %p61_p5 }
  0x91   :  { %69 = shalt.err (!%p66_p7)
}
  0x92   :  { %41 = dma.vmem_to_hbm [thread:$0]  %s39_s11, 16, %s102_s1, [#allocation1]  }
  0x93   :  { %70 = dma.done.wait [#allocation1], 16  }
  0x94   :  { %71 = vsyncadd [#allocation1], 4294967280 }
  0x95   :  { %43 = vsyncpa [#allocation1], 1 }

// kernel: rglru_forward.1
= control target key start
LH: loop header
LB: loop body
LE: loop exit
PB: predicated region body
PF: predicated region fallthrough
CT: control target
= control target key end

     0   :  { %s1354_s0 = inlined_call_operand.hbm [shape: f32[2,16,32], index: 0, kind: input, shape index: {}]   ;;  %s1355_s1 = inlined_call_operand.hbm [shape: bf16[32,32], index: 1, kind: input, shape index: {}]   ;;  %s1356_s2 = inlined_call_operand.hbm [shape: bf16[32,32], index: 2, kind: input, shape index: {}]   ;;  %s1357_s3 = inlined_call_operand.hbm [shape: f32[1,32], index: 3, kind: input, shape index: {}]   ;;  %s1358_s4 = inlined_call_operand.hbm [shape: f32[2,16,32], index: 4, kind: output, shape index: {}]  }
   0x1   :  { %1366 = sst [smem:[#allocation18_spill]] %s1355_s1 }
   0x2   :  { %1367 = sst [smem:[#allocation19_spill]] %s1356_s2 }
   0x3   :  { %1368 = sst [smem:[#allocation20_spill]] %s1358_s4 }
   0x4   :  { %9 = vsyncpa [#allocation4], 0 }
   0x5   :  { %11 = vsyncpa [#allocation4 + $0x1], 0 }
   0x6   :  { %12 = vsyncpa [#allocation7], 0 }
   0x7   :  { %13 = vsyncpa [#allocation10], 0 }
   0x8   :  { %14 = vsyncpa [#allocation5], 0 }
   0x9   :  { %16 = vsyncpa [#allocation5 + $0x1], 0  ;;  %s1041_s15 = smov 0   ;;  %s1043_s16 = smov 0  }
   0xa   :  { %s1045_s17 = smov 0   ;;  %s1047_s18 = smov 0  }
   0xb   :  { %s1049_s19 = smov 0   ;;  %s1051_s20 = smov 0  }
   0xc   :  { %s1053_s21 = smov 0   ;;  %s1055_s22 = smov 0  }
   0xd LB: > { %1369 = sst [smem:[#allocation16_spill]] %s976_s15  ;;  %s600_s23 = sadd.s32 4294967295, %s1004_s22   ;;  %s1004_s22 = sphi %s1055_s22, %s22_s22   ;;  %s1000_s21 = sphi %s1053_s21, %s1397_s21   ;;  %s996_s20 = sphi %s1051_s20, %s1396_s20   ;;  %s992_s19 = sphi %s1049_s19, %s1395_s19   ;;  %s988_s18 = sphi %s1047_s18, %s1394_s18   ;;  %s984_s17 = sphi %s1045_s17, %s1393_s17   ;;  %s980_s16 = sphi %s1043_s16, %s1392_s16   ;;  %s976_s15 = sphi %s1041_s15, %s1391_s15  }
   0xe   : > { %s601_s24 = sadd.s32 4294967294, %s1004_s22   ;;  %p56_p0 = scmp.ne.s32.totalorder %s980_s16, %s976_s15 }
   0xf   : > { %p1085_p1 = scmp.eq.s32.totalorder %s600_s23, 0  ;;  %p1089_p2 = scmp.eq.s32.totalorder %s600_s23, 3 }
  0x10   : > { %p151_p3 = scmp.eq.s32.totalorder %s601_s24, 3  ;;  %p602_p5 = scmp.ge.s32.totalorder %s1004_s22, 1 }
  0x11   : > { %s1370_s25 = scalar_select %p1085_p1, 1, 0 }
  0x12   : > { %s1371_s26 = scalar_select %p1089_p2, 1, 0 }
  0x13   : > { %p1095_p4 = por %p1085_p1, %p56_p0  ;;  %p1100_p6 = por %p151_p3, %p56_p0 }
  0x14   : > { %p158_p7 = scmp.lt.s32.totalorder %s1004_s22, 5  ;;  %s1006_s30 = smov [#allocation6]  }
  0x15   : > { %s1372_s27 = scalar_select %p1095_p4, 1, 0 }
  0x16   : > { %s1373_s28 = scalar_select %p1100_p6, 1, 0 }
  0x17   : > { %p1105_p8 = pnand %p602_p5, %p158_p7  ;;  %s170_s5 = sshll.u32 %s1006_s30, 4  ;;  %s1109_s5 = int_to_ptr.vmem [resolvable:$true] %s170_s5 }
  0x18   : > { %1374 = sst [smem:[#allocation17_spill]] %s1373_s28  ;;  %s1007_s7 = smov [#allocation8]  }
  0x19   : > { %s1375_s29 = scalar_select %p1105_p8, 1, 0 }
  0x1a   : > { %p670_p9 = pneg %p1105_p8  ;;  %s183_s8 = sshll.u32 %s1007_s7, 4  ;;  %s1119_s8 = int_to_ptr.vmem [resolvable:$true] %s183_s8 }
  0x1b   : > { %s1008_s9 = smov [#allocation9]   ;;  %s1377_s1 = sld [smem:[#allocation18_spill]] }
  0x1c   : > { %p1115_p10 = pnand %p670_p9, %p1085_p1  ;;  %s1121_s10 = sshll.u32 %s1008_s9, 4  ;;  %s198_s10 = int_to_ptr.vmem [resolvable:$true] %s1121_s10 }
  0x1e   : > { %p1131_p12 = pneg %p1115_p10 }
  0x21   : > { %s784_s13 = scalar_lea.hbm %s1377_s1, 256 }
  0x22   : > { %p785_p11 = scmp.ne.s32.totalorder %s1377_s1, %s784_s13  ;;  %p791_p3 = scmp.lt.u32.totalorder %s784_s13, %s1377_s1 }
  0x24   : > { %p787_p13 = pnand %p1131_p12, %p785_p11 }
  0x26   : > { %p788_p0 = pneg %p787_p13 }
  0x28   : > { %p793_p5 = pnand %p791_p3, %p788_p0 }
  0x2a   : > { %796 = shalt.err (!%p793_p5)
}
  0x2b   : > { %s797_s9 = scalar_lea.vmem %s1109_s5, 256  ;;  %p805_p1 = scmp.lt.s32.totalorder %s1109_s5, %s1109_s5 }
  0x2c   : > { %p798_p7 = scmp.ne.s32.totalorder %s1109_s5, %s797_s9  ;;  %p806_p4 = scmp.lt.s32.totalorder %s797_s9, %s797_s9 }
  0x2e   : > { %p800_p9 = pnand %p798_p7, %p1131_p12  ;;  %p807_p11 = por %p806_p4, %p805_p1 }
  0x30   : > { %p801_p6 = pneg %p800_p9 }
  0x32   : > { %p808_p13 = pnand %p807_p11, %p801_p6 }
  0x34   : > { %811 = shalt.err (!%p808_p13)
}
  0x35   : > { %s1009_s11 = smov 64   ;;  %s1010_s12 = smov 4  }
  0x36   : > { %673 = dma.hbm_to_vmem [thread:$0]  (!%p1115_p10), %s1377_s1, 256, %s1109_s5, [#allocation7], %s1009_s11, %s1009_s11, %s1010_s12  }
  0x37   : > { %s1379_s2 = sld [smem:[#allocation19_spill]] }
  0x3d   : > { %s812_s7 = scalar_lea.hbm %s1379_s2, 256 }
  0x3e   : > { %p813_p1 = scmp.ne.s32.totalorder %s1379_s2, %s812_s7  ;;  %p819_p0 = scmp.lt.u32.totalorder %s812_s7, %s1379_s2 }
  0x40   : > { %p815_p4 = pnand %p813_p1, %p1131_p12 }
  0x42   : > { %p816_p6 = pneg %p815_p4 }
  0x44   : > { %p821_p3 = pnand %p819_p0, %p816_p6 }
  0x46   : > { %824 = shalt.err (!%p821_p3)
}
  0x47   : > { %s825_s5 = scalar_lea.vmem %s1119_s8, 256  ;;  %p833_p11 = scmp.lt.s32.totalorder %s1119_s8, %s1119_s8 }
  0x48   : > { %p826_p5 = scmp.ne.s32.totalorder %s1119_s8, %s825_s5  ;;  %p834_p13 = scmp.lt.s32.totalorder %s825_s5, %s825_s5 }
  0x4a   : > { %p828_p7 = pnand %p826_p5, %p1131_p12  ;;  %p835_p1 = por %p834_p13, %p833_p11 }
  0x4c   : > { %p829_p9 = pneg %p828_p7 }
  0x4e   : > { %p836_p4 = pnand %p835_p1, %p829_p9 }
  0x50   : > { %839 = shalt.err (!%p836_p4)
}
  0x51   : > { %676 = dma.hbm_to_vmem [thread:$0]  (!%p1115_p10), %s1379_s2, 256, %s1119_s8, [#allocation7], %s1009_s11, %s1009_s11, %s1010_s12  }
  0x52   : > { %s840_s14 = scalar_lea.hbm %s1357_s3, 16 }
  0x53   : > { %p841_p6 = scmp.ne.s32.totalorder %s1357_s3, %s840_s14  ;;  %p847_p5 = scmp.lt.u32.totalorder %s840_s14, %s1357_s3 }
  0x55   : > { %p843_p0 = pnand %p841_p6, %p1131_p12 }
  0x57   : > { %p844_p3 = pneg %p843_p0 }
  0x59   : > { %p849_p7 = pnand %p847_p5, %p844_p3 }
  0x5b   : > { %852 = shalt.err (!%p849_p7)
}
  0x5c   : > { %s853_s5 = scalar_lea.vmem %s198_s10, 16  ;;  %s860_s8 = scalar_lea.vmem %s198_s10, 32 }
  0x5d   : > { %p854_p9 = scmp.ne.s32.totalorder %s198_s10, %s853_s5  ;;  %p861_p1 = scmp.lt.s32.totalorder %s198_s10, %s198_s10 }
  0x5e   : > { %p862_p4 = scmp.lt.s32.totalorder %s860_s8, %s853_s5 }
  0x5f   : > { %p856_p11 = pnand %p854_p9, %p1131_p12 }
  0x60   : > { %p863_p8 = por %p862_p4, %p861_p1 }
  0x61   : > { %p857_p13 = pneg %p856_p11 }
  0x63   : > { %p864_p2 = pnand %p863_p8, %p857_p13 }
  0x65   : > { %867 = shalt.err (!%p864_p2)
}
  0x66   : > { %679 = dma.hbm_to_vmem [thread:$0]  (!%p1115_p10), %s1357_s3, 16, %s198_s10, [#allocation10]  }
  0x67   : > { %s31_s24 = sadd.s32 1, %s996_s20  ;;  %s34_s6 = sadd.s32 1, %s1000_s21 }
  0x68   : > { %p32_p2 = scmp.ge.s32.totalorder %s31_s24, 2  ;;  %s43_s4 = sadd.s32 1, %s984_s17 }
  0x69   : > { %p50_p8 = scmp.ne.s32.totalorder %s984_s17, %s980_s16  ;;  %p51_p12 = scmp.eq.s32.totalorder %s1004_s22, 0 }
  0x6a   : > { %s1399_s24 = smov (%p32_p2, %s31_s24), 0  ;;  %s1401_s6 = smov (!%p32_p2, %s34_s6), %s1000_s21 }
  0x6b   : > { %s39_s15 = ssub.s32 %s996_s20, %s1399_s24  ;;  %p36_p6 = scmp.ge.s32.totalorder %s1401_s6, 2 }
  0x6c   : > { %p1380_p0 = scmp.ne.s32.totalorder %s1371_s26, 0  ;;  %p1211_p10 = por %p51_p12, %p50_p8 }
  0x6d   : > { %p691_p5 = scmp.lt.s32.totalorder %s1004_s22, 4  ;;  %s1403_s6 = smov (%p36_p6, %s1401_s6), 0 }
  0x6e   : > { %p1207_p3 = por %p1380_p0, %p50_p8  ;;  %s208_s13 = sand.u32 1, %s984_s17  }
  0x6f   : > { %s608_s14 = sshll.u32 %s1000_s21, 1  ;;  %s38_s23 = ssub.s32 %s1000_s21, %s1403_s6 }
  0x70   : > { %s40_s30 = sor.u32 %s39_s15, %s38_s23  ;;  %s607_s7 = sshll.u32 %s208_s13, 3 }
  0x71   : > { %p41_p7 = scmp.eq.s32.totalorder %s40_s30, 0  ;;  %s217_s26 = sadd.s32 %s996_s20, %s608_s14 }
  0x72   : > { %s212_s9 = scalar_lea.vmem [#allocation3], %s607_s7  ;;  %s609_s11 = sshll.u32 %s217_s26, 7 }
  0x73   : > { %s221_s5 = sshll.u32 %s212_s9, 4  ;;  %s1231_s2 = scalar_lea.hbm %s1354_s0, %s609_s11  ;;  %s1226_s5 = int_to_ptr.vmem [resolvable:$true] %s221_s5 }
  0x74   : > { %s1224_s8 = scalar_select %p41_p7, %s984_s17, %s43_s4  }
  0x75   : > { %p1237_p9 = pnand %p691_p5, %p1211_p10  ;;  %s209_s4 = scalar_lea.sflag [#allocation4], %s208_s13 }
  0x76   : > { %s868_s14 = scalar_lea.hbm %s1231_s2, 128  ;;  %s873_s23 = scalar_lea.hbm %s1354_s0, 512 }
  0x77   : > { %p869_p11 = scmp.ne.s32.totalorder %s1231_s2, %s868_s14  ;;  %p870_p13 = pneg %p1237_p9 }
  0x78   : > { %p874_p2 = scmp.lt.u32.totalorder %s1231_s2, %s1354_s0  ;;  %p875_p8 = scmp.lt.u32.totalorder %s873_s23, %s868_s14 }
  0x79   : > { %p871_p1 = pnand %p870_p13, %p869_p11  ;;  %p877_p6 = scmp.lt.u32.totalorder %s868_s14, %s1231_s2 }
  0x7a   : > { %p876_p12 = por %p875_p8, %p874_p2 }
  0x7b   : > { %p872_p4 = pneg %p871_p1 }
  0x7c   : > { %p878_p0 = por %p877_p6, %p876_p12 }
  0x7e   : > { %p879_p10 = pnand %p878_p0, %p872_p4 }
  0x80   : > { %882 = shalt.err (!%p879_p10)
}
  0x81   : > { %s883_s13 = scalar_lea.vmem %s1226_s5, 128  ;;  %s1011_s26 = smov [#allocation3]  }
  0x82   : > { %p884_p5 = scmp.ne.s32.totalorder %s1226_s5, %s883_s13  ;;  %s888_s9 = sshll.u32 %s1011_s26, 4  ;;  %s889_s9 = int_to_ptr.vmem [resolvable:$false] %s888_s9 }
  0x83   : > { %s890_s11 = scalar_lea.vmem %s889_s9, 256  ;;  %p891_p1 = scmp.lt.s32.totalorder %s1226_s5, %s889_s9 }
  0x84   : > { %p886_p7 = pnand %p884_p5, %p870_p13  ;;  %p892_p2 = scmp.lt.s32.totalorder %s890_s11, %s883_s13 }
  0x86   : > { %p887_p11 = pneg %p886_p7  ;;  %p893_p8 = por %p892_p2, %p891_p1 }
  0x88   : > { %p894_p12 = pnand %p893_p8, %p887_p11 }
  0x8a   : > { %897 = shalt.err (!%p894_p12)
}
  0x8b   : > { %683 = dma.hbm_to_vmem [thread:$0]  (!%p1237_p9), %s1231_s2, 128, %s1226_s5, %s209_s4  }
  0x8c   : > { %p1384_p4 = scmp.ne.s32.totalorder %s1375_s29, 0 }
  0x8d   : > { %s1269_s12 = sand.u32 (!%p1384_p4), 1, %s980_s16   ;;  %p1385_p13 = scmp.ne.s32.totalorder (!%p1384_p4), %s1372_s27, 0 }
  0x8e   : > { %230 = sbr.rel (%p1384_p4) target bundleno = 489 (0x1e9), region = 36  ;;  %s611_s14 = sshll.u32 (!%p1384_p4), %s1269_s12, 3 }
  0x8f   : > { %s233_s1 = scalar_lea.sflag (!%p1384_p4), [#allocation4], %s1269_s12  ;;  %s236_s10 = scalar_lea.vmem (!%p1384_p4), [#allocation3], %s611_s14 }
  0x95   : > { %959 = dma.done.wait (%p1385_p13), %s233_s1, 128  }
  0x96   : > { %961 = vsyncadd (%p1385_p13), %s233_s1, 4294967168  ;;  %p1386_p6 = scmp.ne.s32.totalorder %s1370_s25, 0 }
  0x98   : > { %963 = dma.done.wait (%p1386_p6), [#allocation7], 512  }
  0x99   : > { %965 = vsyncadd (%p1386_p6), [#allocation7], 4294966784 }
  0x9a   : > { %967 = dma.done.wait (%p1386_p6), [#allocation10], 16  }
  0x9b   : > { %969 = vsyncadd (%p1386_p6), [#allocation10], 4294967280  ;;  %s1285_s2 = scalar_lea.vmem [#allocation11], %s611_s14  ;;  %p616_p9 = scmp.ne.s32.totalorder %s988_s18, 0 }
  0x9c   : > { %vm278_vm0 = vcmask (!%p616_p9), 253952   ;;  %v1012_v0 = vmov (!%p616_p9), 0.0  }
  0x9d   : > { %277 = sbr.rel (%p616_p9) target bundleno = 164 (0xa4), region = 56  ;;  %279 = vst.msk [vmem:[#allocation2] sm:$0x1] (!%p616_p9), %vm278_vm0, %v1012_v0 }
  0xa4 PF: > { %v768_v1 = vld [vmem:[#allocation8] sm:$0xff]   ;;  %v1013_v2 = vmov 0.0   ;;  %v769_v3 = vld [vmem:[#allocation8 + $0x8] sm:$0xff]   ;;  %vm1014_vm1 = vmmov 0   ;;  %v770_v5 = vld [vmem:[#allocation6] sm:$0xff]   ;;  %vm298_vm2 = vcmask 261120   ;;  %v432_v30 = vlaneseq }
  0xa5   : > { %646 = vmatprep.subr.bf16.mxu1 %v1013_v2  ;;  %638 = vmatprep.subr.bf16.mxu0 %v1013_v2  ;;  %v280_v4 = vld [vmem:[%s236_s10] sm:$0xff]  ;;  %v771_v7 = vld [vmem:[#allocation6 + $0x8] sm:$0xff]   ;;  %v625_v19 = vld [vmem:[#allocation9] ss:$0 sm:$0xff]  ;;  %s628_s25 = sshll.u32 %s992_s19, 1  ;;  %s486_s5 = sshll.u32 %s1285_s2, 4  ;;  %s1300_s5 = int_to_ptr.vmem [resolvable:$true] %s486_s5 }
  0xa6   : > { %647 = vmatpush3.bf16.msra.mxu1 %v768_v1  ;;  %650 = vmatprep.mubr.msk.bf16.mxu1 %vm1014_vm1, %v1013_v2  ;;  %v281_v6 = vpack.c.bf16 %v280_v4, %v280_v4  ;;  %v433_v31 = vshrl.u32 %v432_v30, 7  ;;  %s482_s27 = sadd.s32 %s988_s18, %s628_s25  ;;  %v626_v59 = vld [vmem:[#allocation2] ss:$0 sm:$0xff]  ;;  %vm468_vm8 = vcmask 261127   ;;  %s1387_s23 = sld [smem:[#allocation20_spill]] }
  0xa7   : > { %648 = vmatprep.subr.bf16.mxu1 %v1013_v2  ;;  %642 = vmatprep.mubr.msk.bf16.mxu0 %vm1014_vm1, %v1013_v2  ;;  %s629_s29 = sshll.u32 %s482_s27, 7  ;;  %s471_s18 = scalar_lea.sflag [#allocation5], %s1269_s12 }
  0xa8   : > { %639 = vmatpush3.bf16.msra.mxu0 %v770_v5  ;;  %vm434_vm3 = vcmp.ge.s32.totalorder %v433_v31, 1  ;;  %vm442_vm6 = vcmp.ge.s32.totalorder %v433_v31, 2  ;;  %vm450_vm7 = vcmp.ge.s32.totalorder %v433_v31, 4  ;;  %s898_s19 = scalar_lea.vmem %s1300_s5, 128  ;;  %s1015_s7 = smov [#allocation11]  }
  0xa9   : > { %640 = vmatprep.subr.bf16.mxu0 %v1013_v2  ;;  %p899_p0 = scmp.ne.s32.totalorder %s1300_s5, %s898_s19  ;;  %s902_s13 = sshll.u32 %s1015_s7, 4  ;;  %s903_s13 = int_to_ptr.vmem [resolvable:$false] %s902_s13 }
  0xaa   : > { %649 = vmatpush3.bf16.msra.mxu1 %v769_v3  ;;  %s904_s26 = scalar_lea.vmem %s903_s13, 256  ;;  %p905_p7 = scmp.lt.s32.totalorder %s1300_s5, %s903_s13 }
  0xab   : > { %p900_p10 = pnand %p899_p0, %p1207_p3  ;;  %p906_p11 = scmp.lt.s32.totalorder %s904_s26, %s898_s19 }
  0xac   : > { %641 = vmatpush3.bf16.msra.mxu0 %v771_v7  ;;  %s1298_s30 = scalar_lea.hbm %s1387_s23, %s629_s29 }
  0xad   : > { %651 = vmatmul.mubr.msk.bf16.vlgmr.msra.gmra.mrb[0].mxu1 %vm298_vm2, %v281_v6  ;;  %p901_p5 = pneg %p900_p10  ;;  %p907_p1 = por %p906_p11, %p905_p7 }
  0xaf   : > { %643 = vmatmul.mubr.msk.bf16.vlgmr.msra.gmra.mrb[0].mxu0 %vm298_vm2, %v281_v6  ;;  %p908_p2 = pnand %p907_p1, %p901_p5 }
 0x180   : > { %v398_v8 = vpop.f32.mrb[0].mxu1 }
 0x181   : > { %v624_v9 = vmul.f32 -1.442695, %v398_v8  ;;  %v652_v10 = vpop.f32.mrb[1].mxu1 }
 0x182   : > { %v401_v11 = vpop.f32.mrb[2].mxu1  ;;  %v336_v13 = vpop.f32.mrb[0].mxu0 }
 0x183   : > { %772 = vpow2.f32 %v624_v9  ;;  %v653_v12 = vpop.f32.mrb[3].mxu1  ;;  %v644_v14 = vpop.f32.mrb[1].mxu0  ;;  %v620_v23 = vmul.f32 -1.442695, %v336_v13 }
 0x184   : > { %v339_v15 = vpop.f32.mrb[2].mxu0 }
 0x185   : > { %v645_v16 = vpop.f32.mrb[3].mxu0 }
 0x18d   : > { %v773_v17 = vpop.eup %772 }
 0x18e   : > { %v407_v18 = vadd.f32 1.0, %v773_v17 }
 0x190   : > { %774 = vrcp.f32 %v407_v18 }
 0x19a   : > { %v775_v20 = vpop.eup %774 }
 0x19b   : > { %v417_v21 = vmul.f32 %v775_v20, %v625_v19 }
 0x19d   : > { %v418_v22 = vmul.f32 1.442695, %v417_v21 }
 0x19f   : > { %776 = vpow2.f32 %v418_v22 }
 0x1a0   : > { %778 = vpow2.f32 %v620_v23 }
 0x1a9   : > { %v777_v24 = vpop.eup %776 }
 0x1aa   : > { %v420_v25 = vmul.f32 %v777_v24, %v777_v24  ;;  %v779_v26 = vpop.eup %778  ;;  %v435_v32 = vrot.slane %v777_v24, 7 }
 0x1ab   : > { %v345_v28 = vadd.f32 1.0, %v779_v26 }
 0x1ac   : > { %v421_v27 = vsub.f32 1.0, %v420_v25  ;;  %v436_v33 = vsel %vm434_vm3, %v435_v32, 1.0 }
 0x1ad   : > { %v441_v38 = vmul.f32 %v777_v24, %v436_v33 }
 0x1ae   : > { %v422_v29 = vmax.f32 %v421_v27, 0.0 }
 0x1af   : > { %v443_v42 = vrot.slane %v441_v38, 6 }
 0x1b0   : > { %780 = vrsqrt.f32 %v422_v29  ;;  %vm425_vm4 = vcmp.eq.f32.partialorder %v422_v29, inf  ;;  %v428_v37 = vand.u32 2147483648, %v422_v29  ;;  %vm427_vm5 = vcmp.eq.f32.partialorder %v422_v29, 0.0 }
 0x1b1   : > { %782 = vrcp.f32 %v345_v28  ;;  %v444_v45 = vsel %vm442_vm6, %v443_v42, 1.0 }
 0x1b2   : > { %v449_v48 = vmul.f32 %v444_v45, %v441_v38 }
 0x1b4   : > { %v451_v51 = vrot.slane %v449_v48, 4 }
 0x1b6   : > { %v452_v55 = vsel %vm450_vm7, %v451_v51, 1.0 }
 0x1b7   : > { %v457_v57 = vmul.f32 %v452_v55, %v449_v48 }
 0x1b9   : > { %v465_v62 = vmul.f32 %v626_v59, %v457_v57 }
 0x1ba   : > { %v781_v34 = vpop.eup %780 }
 0x1bb   : > { %v424_v35 = vmul.f32 %v781_v34, %v422_v29  ;;  %v783_v36 = vpop.eup %782 }
 0x1bd   : > { %v426_v39 = vsel %vm425_vm4, %v422_v29, %v424_v35 }
 0x1be   : > { %v429_v40 = vsel %vm427_vm5, %v428_v37, %v426_v39 }
 0x1bf   : > { %v430_v41 = vmul.f32 %v783_v36, %v429_v40 }
 0x1c1   : > { %v431_v43 = vmul.f32 %v430_v41, %v280_v4 }
 0x1c3   : > { %v437_v44 = vrot.slane %v431_v43, 7 }
 0x1c5   : > { %v438_v46 = vsel %vm434_vm3, %v437_v44, 0.0 }
 0x1c6   : > { %v439_v47 = vmul.f32 %v777_v24, %v438_v46 }
 0x1c8   : > { %v440_v49 = vadd.f32 %v439_v47, %v431_v43 }
 0x1ca   : > { %v445_v50 = vrot.slane %v440_v49, 6 }
 0x1cc   : > { %v446_v52 = vsel %vm442_vm6, %v445_v50, 0.0 }
 0x1cd   : > { %v447_v53 = vmul.f32 %v446_v52, %v441_v38 }
 0x1cf   : > { %v448_v54 = vadd.f32 %v447_v53, %v440_v49 }
 0x1d1   : > { %v453_v56 = vrot.slane %v448_v54, 4 }
 0x1d3   : > { %v454_v58 = vsel %vm450_vm7, %v453_v56, 0.0 }
 0x1d4   : > { %v455_v60 = vmul.f32 %v454_v58, %v449_v48 }
 0x1d6   : > { %v456_v61 = vadd.f32 %v455_v60, %v448_v54 }
 0x1d8   : > { %v466_v63 = vadd.f32 %v465_v62, %v456_v61 }
 0x1da   : > { %467 = vst.msk [vmem:[%s1285_s2] sm:$0xff] %vm298_vm2, %v466_v63 }
 0x1db   : > { %469 = vst.msk [vmem:[#allocation2 - $0x7] sm:$0x80] %vm468_vm8, %v466_v63 }
 0x1dc   : > { %911 = shalt.err (!%p908_p2)
}
 0x1dd   : > { %s912_s9 = scalar_lea.hbm %s1298_s30, 128  ;;  %s916_s14 = scalar_lea.hbm %s1387_s23, 512 }
 0x1de   : > { %p913_p8 = scmp.ne.s32.totalorder %s1298_s30, %s912_s9  ;;  %p917_p13 = scmp.lt.u32.totalorder %s1298_s30, %s1387_s23 }
 0x1df   : > { %p918_p6 = scmp.lt.u32.totalorder %s916_s14, %s912_s9  ;;  %p920_p0 = scmp.lt.u32.totalorder %s912_s9, %s1298_s30 }
 0x1e0   : > { %p914_p12 = pnand %p913_p8, %p1207_p3 }
 0x1e1   : > { %p919_p9 = por %p918_p6, %p917_p13 }
 0x1e2   : > { %p915_p4 = pneg %p914_p12 }
 0x1e3   : > { %p921_p10 = por %p920_p0, %p919_p9 }
 0x1e5   : > { %p922_p5 = pnand %p921_p10, %p915_p4 }
 0x1e7   : > { %925 = shalt.err (!%p922_p5)
}
 0x1e8   : > { %668 = dma.vmem_to_hbm [thread:$0]  (%p1207_p3), %s1300_s5, 128, %s1298_s30, %s471_s18  }
 0x1e9 PF: > { %s1388_s2 = sld [smem:[#allocation16_spill]]  ;;  %s1389_s25 = sld [smem:[#allocation17_spill]] }
 0x1ea   : > { %p695_p7 = scmp.ge.s32.totalorder %s1004_s22, 2 }
 0x1ef   : > { %s498_s27 = sand.u32 1, %s1388_s2   ;;  %p1390_p11 = scmp.ne.s32.totalorder %s1389_s25, 0 }
 0x1f0   : > { %s499_s29 = scalar_lea.sflag [#allocation5], %s498_s27 }
 0x1f1   : > { %p685_p1 = pnand %p695_p7, %p1390_p11 }
 0x1f3   : > { %971 = dma.done.wait (!%p685_p1), %s499_s29, 128  }
 0x1f4   : > { %973 = vsyncadd (!%p685_p1), %s499_s29, 4294967168  ;;  %s22_s22 = sadd.s32 1, %s1004_s22   ;;  %s1391_s15 = smov %s980_s16 }
 0x1f5   : > { %p19_p2 = scmp.ge.s32.totalorder %s22_s22, 6   ;;  %s1392_s16 = smov %s984_s17 }
 0x1f6   : > { %s1393_s17 = smov %s1224_s8  ;;  %s1394_s18 = smov %s996_s20 }
 0x1f7   : > { %s1395_s19 = smov %s1000_s21  ;;  %s1396_s20 = smov %s1399_s24 }
 0x1f8   : > { %s1397_s21 = smov %s1403_s6  ;;  %21 = sbr.rel (!%p19_p2) target bundleno = 13 (0xd), region = 97 }
 0x1ff   :  { %504 = vsyncpa [#allocation4], 1 }
 0x200   :  { %506 = vsyncpa [#allocation4 + $0x1], 1 }
 0x201   :  { %507 = vsyncpa [#allocation7], 1 }
 0x202   :  { %508 = vsyncpa [#allocation10], 1 }
 0x203   :  { %509 = vsyncpa [#allocation5], 1 }
 0x204   :  { %511 = vsyncpa [#allocation5 + $0x1], 1 }

</bundles_post_ra>
